<compile_context>
chip_gen: v7x
topology: tpu7x:2x2x1
jax: 0.10.0
libtpu: 0.0.40
codegen_flags: <defaults>
</compile_context>

<pallas_src>
import functools

import jax
import jax.numpy as jnp
import numpy as np
from jax.experimental import pallas as pl
from jax.experimental.pallas import tpu as pltpu


_LANES = 128            # vreg lane width
_SUBLANES = 8           # vreg sublane height for 32-bit dtypes
_MAX_ROW_TILE = 1024    # rows per grid step (1024 * 128 * 4 B = 512 KiB / block)
_SMALL_N = 64 * 1024    # below this, a fused pure-XLA path beats a pallas_call
_FULL_BLOCK_BYTES = 1 << 20   # ragged arrays up to 1 MiB go as one full block


def _translate_kernel(z_ref, out_ref, *, table_items, default):
    """Elementwise atomic-number -> label lookup via compare/select cascade."""
    z = z_ref[...]
    out = jnp.full(z.shape, default, dtype=out_ref.dtype)
    for an, label in table_items:          # trace-time constant -> static unroll
        out = jnp.where(z == jnp.int32(an),
                        jnp.asarray(label, out_ref.dtype), out)
    out_ref[...] = out


def _pick_row_tile(rows):
    """Largest row tile <= _MAX_ROW_TILE that keeps the grid >= 2 steps when
    there is enough work (so v7x's two TensorCores can split the axis)."""
    half = -(-rows // 2)
    half = -(-half // _SUBLANES) * _SUBLANES      # round up to a sublane multiple
    tile = min(_MAX_ROW_TILE, half)
    if tile >= rows:
        return rows                               # single block == full array dim
    return tile


def _pallas_translate(z_i32, table_items, default, out_dtype):
    shape = z_i32.shape
    n = z_i32.size
    kernel = functools.partial(_translate_kernel,
                               table_items=table_items, default=default)

    def tiled_call(z2d):
        rows = z2d.shape[0]
        row_tile = _pick_row_tile(rows)
        grid = (-(-rows // row_tile),)            # Pallas masks the ragged block
        return pl.pallas_call(
            kernel,
            out_shape=jax.ShapeDtypeStruct(z2d.shape, out_dtype),
            grid_spec=pltpu.PrefetchScalarGridSpec(
                num_scalar_prefetch=0,
                grid=grid,
                in_specs=[pl.BlockSpec((row_tile, _LANES), lambda i: (i, 0))],
                out_specs=pl.BlockSpec((row_tile, _LANES), lambda i: (i, 0)),
            ),
            compiler_params=pltpu.CompilerParams(
                dimension_semantics=("parallel",)),
        )(z2d)

    if n % _LANES == 0:
        # Lane-aligned: free reshape into a lane-dense slab; no pad, no slice.
        out2d = tiled_call(z_i32.reshape(n // _LANES, _LANES))
        return out2d.reshape(shape)

    if n * 4 <= _FULL_BLOCK_BYTES:
        # Small ragged shape: one full-array block (block dims == array dims).
        z2d = (z_i32.reshape(n // shape[-1], shape[-1]) if z_i32.ndim >= 2
               else z_i32.reshape(1, n))
        out2d = pl.pallas_call(
            kernel,
            out_shape=jax.ShapeDtypeStruct(z2d.shape, out_dtype),
        )(z2d)
        return out2d.reshape(shape)

    # Large ragged shape (rare): pad only to the next multiple of 128 lanes.
    rows = -(-n // _LANES)
    pad = rows * _LANES - n
    z2d = jnp.pad(z_i32.reshape(-1), (0, pad),
                  constant_values=-1).reshape(rows, _LANES)
    out2d = tiled_call(z2d)
    return out2d.reshape(-1)[:n].reshape(shape)


def _xla_translate(z_i32, table_items, default, out_dtype):
    out = jnp.full(z_i32.shape, default, dtype=out_dtype)
    for an, label in table_items:
        out = jnp.where(z_i32 == an, jnp.asarray(label, out_dtype), out)
    return out


def make_translate_atomic_symbols(translation_table, *, default_label=-1,
                                  out_dtype=jnp.int32, force_pallas=False):
    """Returns a jitted forward(z, r) -> (new_z, r): the Pallas equivalent of
    TranslateAtomicSymbols(translation_table).forward((z, r)).

    Atomic numbers absent from the table (and -1 padded slots) map to
    `default_label`.  `out_dtype` may be set to int8 (labels are tiny) to cut
    the store-side HBM traffic 4x if the consumer accepts it; default int32
    mirrors the upstream integer-label semantics (torch.long under JAX x32).
    """
    table_items = tuple(sorted((int(k), int(v))
                               for k, v in translation_table.items()))
    default = int(default_label)

    @jax.jit
    def forward(z, r):
        z_i32 = z.astype(jnp.int32)
        if z_i32.size == 0 or (z_i32.size < _SMALL_N and not force_pallas):
            new_z = _xla_translate(z_i32, table_items, default, out_dtype)
        else:
            new_z = _pallas_translate(z_i32, table_items, default, out_dtype)
        return new_z, r

    return forward


if __name__ == "__main__":
    key = jax.random.PRNGKey(0)
    table = {1: 0, 6: 1, 7: 2, 8: 3}          # H, C, N, O -> label indices

    # force_pallas so the demo exercises the Pallas kernel even at small shapes
    fwd = make_translate_atomic_symbols(table, force_pallas=True)

    def check(n_batch, n_atoms, subkey):
        k1, k2, k3 = jax.random.split(subkey, 3)
        species = jnp.array([1, 6, 7, 8], dtype=jnp.int32)
        z = species[jax.random.randint(k1, (n_batch, n_atoms), 0, 4)]
        # pad some trailing atom slots with -1 (as the upstream dataloader does)
        pad_mask = jax.random.bernoulli(k2, 0.25, (n_batch, n_atoms))
        z = jnp.where(pad_mask, jnp.int32(-1), z)
        r = jax.random.normal(k3, (n_batch, n_atoms, 3), dtype=jnp.float32)

        new_z, r_out = fwd(z, r)
        jax.block_until_ready((new_z, r_out))

        # reference: plain numpy dictionary lookup (semantics of map_an2labels)
        z_np = np.asarray(z)
        ref = np.full_like(z_np, -1)
        for an, lab in table.items():
            ref[z_np == an] = lab
        assert new_z.dtype == jnp.int32
        assert np.array_equal(np.asarray(new_z), ref), "label translation mismatch"
        assert np.array_equal(np.asarray(r_out), np.asarray(r)), "r must pass through"

    k1, k2 = jax.random.split(key)
    check(2, 16, k1)      # small ragged shape  -> single full-block Pallas path
    check(4, 128, k2)     # lane-aligned shape  -> tiled lane-dense Pallas path
    print("KERNEL_OK")
</pallas_src>

<mosaic_0001>
module attributes {stable_mosaic.version = 11 : i64} {
  func.func @_translate_kernel(%arg0: memref<2x16xi32, #tpu.memory_space<vmem>>, %arg1: memref<2x16xi32, #tpu.memory_space<vmem>>) attributes {dimension_semantics = [], scalar_prefetch = 0 : i64, scratch_operands = 0 : i64, tpu.core_type = #tpu.core_type<tc>} {
    %c0 = arith.constant 0 : index
    %c0_0 = arith.constant 0 : index
    %0 = vector.load %arg0[%c0, %c0_0] : memref<2x16xi32, #tpu.memory_space<vmem>>, vector<2x16xi32>
    %c-1_i32 = arith.constant -1 : i32
    %1 = vector.broadcast %c-1_i32 : i32 to vector<2x16xi32>
    %c1_i32 = arith.constant 1 : i32
    %2 = vector.broadcast %c1_i32 : i32 to vector<2x16xi32>
    %3 = arith.cmpi eq, %0, %2 : vector<2x16xi32>
    %c0_i32 = arith.constant 0 : i32
    %4 = vector.broadcast %c0_i32 : i32 to vector<2x16xi32>
    %5 = arith.select %3, %4, %1 : vector<2x16xi1>, vector<2x16xi32>
    %c6_i32 = arith.constant 6 : i32
    %6 = vector.broadcast %c6_i32 : i32 to vector<2x16xi32>
    %7 = arith.cmpi eq, %0, %6 : vector<2x16xi32>
    %c1_i32_1 = arith.constant 1 : i32
    %8 = vector.broadcast %c1_i32_1 : i32 to vector<2x16xi32>
    %9 = arith.select %7, %8, %5 : vector<2x16xi1>, vector<2x16xi32>
    %c7_i32 = arith.constant 7 : i32
    %10 = vector.broadcast %c7_i32 : i32 to vector<2x16xi32>
    %11 = arith.cmpi eq, %0, %10 : vector<2x16xi32>
    %c2_i32 = arith.constant 2 : i32
    %12 = vector.broadcast %c2_i32 : i32 to vector<2x16xi32>
    %13 = arith.select %11, %12, %9 : vector<2x16xi1>, vector<2x16xi32>
    %c8_i32 = arith.constant 8 : i32
    %14 = vector.broadcast %c8_i32 : i32 to vector<2x16xi32>
    %15 = arith.cmpi eq, %0, %14 : vector<2x16xi32>
    %c3_i32 = arith.constant 3 : i32
    %16 = vector.broadcast %c3_i32 : i32 to vector<2x16xi32>
    %17 = arith.select %15, %16, %13 : vector<2x16xi1>, vector<2x16xi32>
    %c0_2 = arith.constant 0 : index
    %c0_3 = arith.constant 0 : index
    %18 = vector.load %arg1[%c0_2, %c0_3] : memref<2x16xi32, #tpu.memory_space<vmem>>, vector<2x16xi32>
    tpu.vector_store %arg1[%c0_2, %c0_3], %17 {strides = array<i32>} : memref<2x16xi32, #tpu.memory_space<vmem>>, vector<2x16xi32>,
    return
  }
}

</mosaic_0001>

<bundles_post_ra>
// kernel: forward.1
= control target key start
LH: loop header
LB: loop body
LE: loop exit
PB: predicated region body
PF: predicated region fallthrough
CT: control target
= control target key end

     0   :  { %6 = vsyncpa [#allocation3], 0  ;;  %s135_s0 = inlined_call_operand.hbm [shape: s32[2,16], index: 0, kind: input, shape index: {}]   ;;  %s136_s1 = inlined_call_operand.hbm [shape: s32[2,16], index: 1, kind: output, shape index: {}]  }
   0x1   :  { %7 = vsyncpa [#allocation4], 0  ;;  %s98_s6 = smov [#allocation2]   ;;  %s50_s10 = scalar_lea.hbm %s135_s0, 32 }
   0x2   :  { %s14_s7 = sshll.u32 %s98_s6, 4  ;;  %p51_p0 = scmp.ne.s32.totalorder %s135_s0, %s50_s10  ;;  %s15_s7 = int_to_ptr.vmem [resolvable:$true] %s14_s7 }
   0x3   :  { %p54_p1 = scmp.lt.u32.totalorder %s50_s10, %s135_s0 }
   0x5   :  { %p56_p2 = pnand %p54_p1, %p51_p0 }
   0x7   :  { %59 = shalt.err (!%p56_p2)
}
   0x8   :  { %s60_s15 = scalar_lea.vmem %s15_s7, 32  ;;  %p65_p4 = scmp.lt.s32.totalorder %s15_s7, %s15_s7 }
   0x9   :  { %p61_p3 = scmp.ne.s32.totalorder %s15_s7, %s60_s15  ;;  %p66_p5 = scmp.lt.s32.totalorder %s60_s15, %s60_s15 }
   0xb   :  { %p67_p6 = por %p66_p5, %p65_p4 }
   0xd   :  { %p68_p7 = pnand %p67_p6, %p61_p3 }
   0xf   :  { %71 = shalt.err (!%p68_p7)
}
  0x10   :  { %17 = dma.hbm_to_vmem [thread:$0]  %s135_s0, 32, %s15_s7, [#allocation3]  }
  0x11   :  { %94 = dma.done.wait [#allocation3], 32  }
  0x12   :  { %95 = vsyncadd [#allocation3], 4294967264  ;;  %v21_v0 = vld [vmem:[#allocation2] sm:$0x3]  ;;  %s99_s18 = smov [#allocation5]   ;;  %v100_v1 = vmov 4294967295  }
  0x13   :  { %vm22_vm0 = vcmp.eq.s32.totalorder %v21_v0, 1  ;;  %vm24_vm1 = vcmp.eq.s32.totalorder %v21_v0, 6  ;;  %vm26_vm2 = vcmp.eq.s32.totalorder %v21_v0, 7  ;;  %s38_s19 = sshll.u32 %s99_s18, 4  ;;  %vm28_vm3 = vcmp.eq.s32.totalorder %v21_v0, 8  ;;  %s39_s19 = int_to_ptr.vmem [resolvable:$true] %s38_s19 }
  0x14   :  { %v23_v2 = vsel %vm22_vm0, 0, %v100_v1  ;;  %vm30_vm4 = vcmask 123904   ;;  %s72_s20 = scalar_lea.vmem %s39_s19, 32  ;;  %p77_p9 = scmp.lt.s32.totalorder %s39_s19, %s39_s19 }
  0x15   :  { %v25_v3 = vsel %vm24_vm1, 1, %v23_v2  ;;  %p73_p8 = scmp.ne.s32.totalorder %s39_s19, %s72_s20  ;;  %p78_p10 = scmp.lt.s32.totalorder %s72_s20, %s72_s20 }
  0x16   :  { %v27_v4 = vsel %vm26_vm2, 2, %v25_v3 }
  0x17   :  { %v29_v5 = vsel %vm28_vm3, 3, %v27_v4  ;;  %p79_p11 = por %p78_p10, %p77_p9 }
  0x18   :  { %31 = vst.msk [vmem:[#allocation5] sm:$0x3] %vm30_vm4, %v29_v5 }
  0x19   :  { %p80_p12 = pnand %p79_p11, %p73_p8 }
  0x1b   :  { %83 = shalt.err (!%p80_p12)
}
  0x1c   :  { %s84_s22 = scalar_lea.hbm %s136_s1, 32 }
  0x1d   :  { %p85_p13 = scmp.ne.s32.totalorder %s136_s1, %s84_s22  ;;  %p88_p0 = scmp.lt.u32.totalorder %s84_s22, %s136_s1 }
  0x1f   :  { %p90_p1 = pnand %p88_p0, %p85_p13 }
  0x21   :  { %93 = shalt.err (!%p90_p1)
}
  0x22   :  { %41 = dma.vmem_to_hbm [thread:$0]  %s39_s19, 32, %s136_s1, [#allocation4]  }
  0x23   :  { %96 = dma.done.wait [#allocation4], 32  }
  0x24   :  { %97 = vsyncadd [#allocation4], 4294967264 }
  0x25   :  { %45 = vsyncpa [#allocation3], 1 }
  0x26   :  { %46 = vsyncpa [#allocation4], 1 }

</bundles_post_ra>
